<compile_context>
chip_gen: v6e
topology: v6e:2x2x1
jax: 0.10.0
libtpu: 0.0.40
codegen_flags: <defaults>
</compile_context>

<pallas_src>
import math

import jax
import jax.numpy as jnp
from jax.experimental import pallas as pl
from jax.experimental.pallas import tpu as pltpu

# ---------------- model dimensions (small, synthetic) ----------------
B = 2            # batch
C_IN = 4         # image channels
H = W = 16       # spatial
HW = H * W       # flattened spatial (=256, lane-dense)
D = 32           # embedding / feature dim
NQ = 64          # number of BEV queries
N_CLS = 10       # classes
N_REG = 8        # bbox regression params
HEAD_PAD = 128   # single lane-dense output slab width
BEV_COL = HEAD_PAD - D   # bev embedding packed into lanes 96:128


def _tensorcores_per_chip():
    """v7x exposes 2 TensorCores per chip -> keep the parallel batch grid;
    v5e/v6e are single-TC -> collapse the grid to one step."""
    try:
        kind = jax.devices()[0].device_kind.lower()
    except Exception:
        return 1
    if "v7" in kind or "7x" in kind or "v4" in kind or "v5p" in kind:
        return 2
    return 1


# -------- fused kernel: conv1x1+ReLU -> BEV cross-attn -> merged head --------
def make_fused_kernel(bb):
    """Processes `bb` batch elements per grid step (bb=1 on v7x, bb=B else)."""

    def kernel(x_ref, wconv_ref, q_ref, whead_ref, bhead_ref, out_ref):
        # x_ref:     (bb, C_IN, HW) f32   image, channels on sublanes
        # wconv_ref: (D, C_IN+1)    bf16  [w_conv | b_conv] (bias folded)
        # q_ref:     (NQ, D)        bf16  BEV queries, 1/sqrt(D) pre-folded
        # whead_ref: (D, HEAD_PAD)  bf16  [w_cls | w_reg | 0-pad | I_D]
        # bhead_ref: (1, HEAD_PAD)  f32
        # out_ref:   (bb, NQ, HEAD_PAD) f32
        ones_row = jnp.ones((1, HW), jnp.float32)                   # hoisted
        col = jax.lax.broadcasted_iota(jnp.int32, (NQ, HEAD_PAD), 1)  # hoisted

        for b in range(bb):
            # extract_feat: 1x1 conv as (D,C+1)@(C+1,HW) bf16 matmul with the
            # conv bias realized via the appended constant-1 row; lane-dense
            # (D, HW) orientation so QK needs no transpose.
            x = jnp.concatenate([x_ref[b], ones_row], axis=0).astype(jnp.bfloat16)
            feats = jnp.dot(wconv_ref[...], x,
                            preferred_element_type=jnp.float32)     # (D, HW)
            feats = jnp.maximum(feats, 0.0)
            feats_bf = feats.astype(jnp.bfloat16)                   # K and V

            # cross attention: scale already folded into q (bf16 in, f32 acc).
            s = jnp.dot(q_ref[...], feats_bf,
                        preferred_element_type=jnp.float32)         # (NQ, HW)

            # safe softmax in f32; divide via EUP reciprocal.
            m = jnp.max(s, axis=-1, keepdims=True)
            p = jnp.exp(s - m)
            denom = jnp.sum(p, axis=-1, keepdims=True)
            p = p * pl.reciprocal(denom, approx=True)

            # bev = P @ V contracting the HW (lane) dims directly; identical
            # lowering to the reference `jnp.dot(q, k.T)` idiom.
            bev = jax.lax.dot_general(
                p.astype(jnp.bfloat16), feats_bf,
                dimension_numbers=(((1,), (1,)), ((), ())),
                preferred_element_type=jnp.float32)                 # (NQ, D)

            # merged head: one lane-dense 128-wide matmul produces cls, reg
            # AND (via the identity block) a copy of bev in lanes 96:128 ->
            # a single unmasked (NQ,128) store, no separate bev output.
            h = jnp.dot(bev.astype(jnp.bfloat16), whead_ref[...],
                        preferred_element_type=jnp.float32) + bhead_ref[...]
            out_ref[b] = jnp.where(col < N_CLS, jax.nn.sigmoid(h), h)

    return kernel


# ---------------- full forward (mirrors OnnxWrapper.forward) ----------------
def build_forward(parallel_batch):
    bb = 1 if parallel_batch else B
    call = pl.pallas_call(
        make_fused_kernel(bb),
        grid=(B // bb,),
        in_specs=[
            pl.BlockSpec((bb, C_IN, HW), lambda i: (i, 0, 0)),   # image
            pl.BlockSpec((D, C_IN + 1), lambda i: (0, 0)),       # conv W|b
            pl.BlockSpec((NQ, D), lambda i: (0, 0)),             # BEV queries
            pl.BlockSpec((D, HEAD_PAD), lambda i: (0, 0)),       # merged head W
            pl.BlockSpec((1, HEAD_PAD), lambda i: (0, 0)),       # merged head b
        ],
        out_specs=pl.BlockSpec((bb, NQ, HEAD_PAD), lambda i: (i, 0, 0)),
        out_shape=jax.ShapeDtypeStruct((B, NQ, HEAD_PAD), jnp.float32),
        compiler_params=pltpu.CompilerParams(
            dimension_semantics=("parallel",)),
    )

    @jax.jit
    def forward(img, params):
        # NCHW -> (B, C, HW): pure reshape, no transpose (C stays on sublanes,
        # HW=256 lands lane-dense).
        x = img.reshape(B, C_IN, HW)
        head = call(x, params["w_conv_aug"], params["bev_queries_scaled"],
                    params["w_head"], params["b_head"])
        # slice the single lane-dense slab apart in the wrapper.
        cls_scores = head[:, :, :N_CLS]
        bbox_preds = head[:, :, N_CLS:N_CLS + N_REG]
        new_prev_bev = head[:, :, BEV_COL:BEV_COL + D]
        # (new_prev_bev, bbox_results) analogue
        return new_prev_bev, (cls_scores, bbox_preds)

    return forward


onnx_wrapper_forward = build_forward(_tensorcores_per_chip() > 1)


def init_params(key):
    ks = jax.random.split(key, 4)

    # conv: bias folded as an extra K column; stored pre-transposed + bf16.
    w_conv = 0.1 * jax.random.normal(ks[0], (D, C_IN), jnp.float32)
    b_conv = jnp.zeros((D, 1), jnp.float32)
    w_conv_aug = jnp.concatenate([w_conv, b_conv], axis=1).astype(jnp.bfloat16)

    # BEV queries: 1/sqrt(D) pre-folded, pre-cast to bf16.
    q = 0.1 * jax.random.normal(ks[1], (NQ, D), jnp.float32)
    bev_queries_scaled = (q * (1.0 / math.sqrt(D))).astype(jnp.bfloat16)

    # merged head: [w_cls | w_reg | 0-pad | I_D]; the identity block copies
    # the bev embedding into output lanes BEV_COL:BEV_COL+D.
    w_cls = 0.1 * jax.random.normal(ks[2], (D, N_CLS), jnp.float32)
    w_reg = 0.1 * jax.random.normal(ks[3], (D, N_REG), jnp.float32)
    pad = jnp.zeros((D, BEV_COL - N_CLS - N_REG), jnp.float32)
    eye = jnp.eye(D, dtype=jnp.float32)
    w_head = jnp.concatenate([w_cls, w_reg, pad, eye], axis=1).astype(jnp.bfloat16)

    # bias (zeros; bev lanes must stay zero so bev passes through unchanged).
    b_head = jnp.zeros((1, HEAD_PAD), jnp.float32)

    return {
        "w_conv_aug": w_conv_aug,
        "bev_queries_scaled": bev_queries_scaled,
        "w_head": w_head,
        "b_head": b_head,
    }


if __name__ == "__main__":
    key = jax.random.PRNGKey(0)
    k_img, k_par = jax.random.split(key)
    img = jax.random.normal(k_img, (B, C_IN, H, W), jnp.float32)  # NCHW input
    params = init_params(k_par)

    new_prev_bev, (cls_scores, bbox_preds) = onnx_wrapper_forward(img, params)
    jax.block_until_ready((new_prev_bev, cls_scores, bbox_preds))

    assert new_prev_bev.shape == (B, NQ, D)
    assert cls_scores.shape == (B, NQ, N_CLS)
    assert bbox_preds.shape == (B, NQ, N_REG)
    assert bool(jnp.all(jnp.isfinite(new_prev_bev)))
    assert bool(jnp.all((cls_scores >= 0.0) & (cls_scores <= 1.0)))
    print("KERNEL_OK")
</pallas_src>

<mosaic_0001>
module attributes {stable_mosaic.version = 11 : i64} {
  func.func @kernel(%arg0: i32, %arg1: memref<2x4x256xf32, #tpu.memory_space<vmem>>, %arg2: memref<32x5xbf16, #tpu.memory_space<vmem>>, %arg3: memref<64x32xbf16, #tpu.memory_space<vmem>>, %arg4: memref<32x128xbf16, #tpu.memory_space<vmem>>, %arg5: memref<1x128xf32, #tpu.memory_space<vmem>>, %arg6: memref<2x64x128xf32, #tpu.memory_space<vmem>>) attributes {dimension_semantics = [#tpu.dimension_semantics<parallel>], iteration_bounds = array<i64: 1>, scalar_prefetch = 0 : i64, scratch_operands = 0 : i64, tpu.core_type = #tpu.core_type<tc>, window_params = [{transform_indices = @transform_0, window_bounds = array<i64: 2, 4, 256>}, {pipeline_mode = #tpu.pipeline_mode<synchronous>, transform_indices = @transform_1, window_bounds = array<i64: 32, 5>}, {pipeline_mode = #tpu.pipeline_mode<synchronous>, transform_indices = @transform_2, window_bounds = array<i64: 64, 32>}, {pipeline_mode = #tpu.pipeline_mode<synchronous>, transform_indices = @transform_3, window_bounds = array<i64: 32, 128>}, {pipeline_mode = #tpu.pipeline_mode<synchronous>, transform_indices = @transform_4, window_bounds = array<i64: 1, 128>}, {transform_indices = @transform_5, window_bounds = array<i64: 2, 64, 128>}]} {
    %cst = arith.constant 1.000000e+00 : f32
    %0 = vector.broadcast %cst : f32 to vector<1x256xf32>
    %1 = tpu.iota {dimensions = array<i32: 1>} : vector<64x128xi32>
    %c0 = arith.constant 0 : index
    %c0_0 = arith.constant 0 : index
    %c0_1 = arith.constant 0 : index
    %2 = vector.load %arg1[%c0, %c0_0, %c0_1] : memref<2x4x256xf32, #tpu.memory_space<vmem>>, vector<1x4x256xf32>
    %3 = vector.shape_cast %2 : vector<1x4x256xf32> to vector<4x256xf32>
    %4 = tpu.concatenate %3, %0 in 0 : vector<4x256xf32>, vector<1x256xf32> -> vector<5x256xf32>
    %5 = arith.truncf %4 : vector<5x256xf32> to vector<5x256xbf16>
    %c0_2 = arith.constant 0 : index
    %c0_3 = arith.constant 0 : index
    %6 = vector.load %arg2[%c0_2, %c0_3] : memref<32x5xbf16, #tpu.memory_space<vmem>>, vector<32x5xbf16>
    %cst_4 = arith.constant dense<0.000000e+00> : vector<32x256xf32>
    %7 = tpu.matmul %6, %5, %cst_4 {dimension_numbers = #tpu.dot_dimension_numbers<[1], [0], [0], [1], [0, 0, 1, 1], [], []>} : vector<32x5xbf16>, vector<5x256xbf16>, vector<32x256xf32> -> vector<32x256xf32>
    %cst_5 = arith.constant 0.000000e+00 : f32
    %8 = vector.broadcast %cst_5 : f32 to vector<32x256xf32>
    %9 = arith.maximumf %7, %8 : vector<32x256xf32>
    %10 = arith.truncf %9 : vector<32x256xf32> to vector<32x256xbf16>
    %c0_6 = arith.constant 0 : index
    %c0_7 = arith.constant 0 : index
    %11 = vector.load %arg3[%c0_6, %c0_7] : memref<64x32xbf16, #tpu.memory_space<vmem>>, vector<64x32xbf16>
    %cst_8 = arith.constant dense<0.000000e+00> : vector<64x256xf32>
    %12 = tpu.matmul %11, %10, %cst_8 {dimension_numbers = #tpu.dot_dimension_numbers<[1], [0], [0], [1], [0, 0, 1, 1], [], []>} : vector<64x32xbf16>, vector<32x256xbf16>, vector<64x256xf32> -> vector<64x256xf32>
    %cst_9 = arith.constant dense<0xFF800000> : vector<64xf32>
    %13 = vector.multi_reduction <maximumf>, %12, %cst_9 [1] : vector<64x256xf32> to vector<64xf32>
    %14 = vector.shape_cast %13 : vector<64xf32> to vector<64x1xf32>
    %15 = vector.broadcast %14 : vector<64x1xf32> to vector<64x256xf32>
    %16 = arith.subf %12, %15 : vector<64x256xf32>
    %17 = math.exp %16 : vector<64x256xf32>
    %cst_10 = arith.constant dense<0.000000e+00> : vector<64xf32>
    %18 = vector.multi_reduction <add>, %17, %cst_10 [1] : vector<64x256xf32> to vector<64xf32>
    %19 = vector.shape_cast %18 : vector<64xf32> to vector<64x1xf32>
    %20 = tpu.reciprocal %19 {approx = true} : vector<64x1xf32> -> vector<64x1xf32>
    %21 = vector.broadcast %20 : vector<64x1xf32> to vector<64x256xf32>
    %22 = arith.mulf %17, %21 : vector<64x256xf32>
    %23 = arith.truncf %22 : vector<64x256xf32> to vector<64x256xbf16>
    %cst_11 = arith.constant dense<0.000000e+00> : vector<64x32xf32>
    %24 = tpu.matmul %23, %10, %cst_11 {dimension_numbers = #tpu.dot_dimension_numbers<[1], [1], [0], [0], [0, 0, 1, 0], [], []>} : vector<64x256xbf16>, vector<32x256xbf16>, vector<64x32xf32> -> vector<64x32xf32>
    %25 = arith.truncf %24 : vector<64x32xf32> to vector<64x32xbf16>
    %c0_12 = arith.constant 0 : index
    %c0_13 = arith.constant 0 : index
    %26 = vector.load %arg4[%c0_12, %c0_13] : memref<32x128xbf16, #tpu.memory_space<vmem>>, vector<32x128xbf16>
    %cst_14 = arith.constant dense<0.000000e+00> : vector<64x128xf32>
    %27 = tpu.matmul %25, %26, %cst_14 {dimension_numbers = #tpu.dot_dimension_numbers<[1], [0], [0], [1], [0, 0, 1, 1], [], []>} : vector<64x32xbf16>, vector<32x128xbf16>, vector<64x128xf32> -> vector<64x128xf32>
    %c0_15 = arith.constant 0 : index
    %c0_16 = arith.constant 0 : index
    %28 = vector.load %arg5[%c0_15, %c0_16] : memref<1x128xf32, #tpu.memory_space<vmem>>, vector<1x128xf32>
    %29 = vector.broadcast %28 : vector<1x128xf32> to vector<64x128xf32>
    %30 = arith.addf %27, %29 : vector<64x128xf32>
    %c10_i32 = arith.constant 10 : i32
    %31 = vector.broadcast %c10_i32 : i32 to vector<64x128xi32>
    %32 = arith.cmpi slt, %1, %31 : vector<64x128xi32>
    %33 = arith.negf %30 : vector<64x128xf32>
    %34 = math.exp %33 : vector<64x128xf32>
    %cst_17 = arith.constant 1.000000e+00 : f32
    %35 = vector.broadcast %cst_17 : f32 to vector<64x128xf32>
    %36 = arith.addf %35, %34 : vector<64x128xf32>
    %37 = arith.divf %35, %36 : vector<64x128xf32>
    %38 = arith.select %32, %37, %30 : vector<64x128xi1>, vector<64x128xf32>
    %c0_18 = arith.constant 0 : index
    %c0_19 = arith.constant 0 : index
    %c0_20 = arith.constant 0 : index
    %39 = vector.load %arg6[%c0_18, %c0_19, %c0_20] : memref<2x64x128xf32, #tpu.memory_space<vmem>>, vector<1x64x128xf32>
    %40 = vector.shape_cast %39 : vector<1x64x128xf32> to vector<64x128xf32>
    %41 = vector.shape_cast %38 : vector<64x128xf32> to vector<1x64x128xf32>
    tpu.vector_store %arg6[%c0_18, %c0_19, %c0_20], %41 {strides = array<i32>} : memref<2x64x128xf32, #tpu.memory_space<vmem>>, vector<1x64x128xf32>,
    %c1 = arith.constant 1 : index
    %c0_21 = arith.constant 0 : index
    %c0_22 = arith.constant 0 : index
    %42 = vector.load %arg1[%c1, %c0_21, %c0_22] : memref<2x4x256xf32, #tpu.memory_space<vmem>>, vector<1x4x256xf32>
    %43 = vector.shape_cast %42 : vector<1x4x256xf32> to vector<4x256xf32>
    %44 = tpu.concatenate %43, %0 in 0 : vector<4x256xf32>, vector<1x256xf32> -> vector<5x256xf32>
    %45 = arith.truncf %44 : vector<5x256xf32> to vector<5x256xbf16>
    %c0_23 = arith.constant 0 : index
    %c0_24 = arith.constant 0 : index
    %46 = vector.load %arg2[%c0_23, %c0_24] : memref<32x5xbf16, #tpu.memory_space<vmem>>, vector<32x5xbf16>
    %cst_25 = arith.constant dense<0.000000e+00> : vector<32x256xf32>
    %47 = tpu.matmul %46, %45, %cst_25 {dimension_numbers = #tpu.dot_dimension_numbers<[1], [0], [0], [1], [0, 0, 1, 1], [], []>} : vector<32x5xbf16>, vector<5x256xbf16>, vector<32x256xf32> -> vector<32x256xf32>
    %cst_26 = arith.constant 0.000000e+00 : f32
    %48 = vector.broadcast %cst_26 : f32 to vector<32x256xf32>
    %49 = arith.maximumf %47, %48 : vector<32x256xf32>
    %50 = arith.truncf %49 : vector<32x256xf32> to vector<32x256xbf16>
    %c0_27 = arith.constant 0 : index
    %c0_28 = arith.constant 0 : index
    %51 = vector.load %arg3[%c0_27, %c0_28] : memref<64x32xbf16, #tpu.memory_space<vmem>>, vector<64x32xbf16>
    %cst_29 = arith.constant dense<0.000000e+00> : vector<64x256xf32>
    %52 = tpu.matmul %51, %50, %cst_29 {dimension_numbers = #tpu.dot_dimension_numbers<[1], [0], [0], [1], [0, 0, 1, 1], [], []>} : vector<64x32xbf16>, vector<32x256xbf16>, vector<64x256xf32> -> vector<64x256xf32>
    %cst_30 = arith.constant dense<0xFF800000> : vector<64xf32>
    %53 = vector.multi_reduction <maximumf>, %52, %cst_30 [1] : vector<64x256xf32> to vector<64xf32>
    %54 = vector.shape_cast %53 : vector<64xf32> to vector<64x1xf32>
    %55 = vector.broadcast %54 : vector<64x1xf32> to vector<64x256xf32>
    %56 = arith.subf %52, %55 : vector<64x256xf32>
    %57 = math.exp %56 : vector<64x256xf32>
    %cst_31 = arith.constant dense<0.000000e+00> : vector<64xf32>
    %58 = vector.multi_reduction <add>, %57, %cst_31 [1] : vector<64x256xf32> to vector<64xf32>
    %59 = vector.shape_cast %58 : vector<64xf32> to vector<64x1xf32>
    %60 = tpu.reciprocal %59 {approx = true} : vector<64x1xf32> -> vector<64x1xf32>
    %61 = vector.broadcast %60 : vector<64x1xf32> to vector<64x256xf32>
    %62 = arith.mulf %57, %61 : vector<64x256xf32>
    %63 = arith.truncf %62 : vector<64x256xf32> to vector<64x256xbf16>
    %cst_32 = arith.constant dense<0.000000e+00> : vector<64x32xf32>
    %64 = tpu.matmul %63, %50, %cst_32 {dimension_numbers = #tpu.dot_dimension_numbers<[1], [1], [0], [0], [0, 0, 1, 0], [], []>} : vector<64x256xbf16>, vector<32x256xbf16>, vector<64x32xf32> -> vector<64x32xf32>
    %65 = arith.truncf %64 : vector<64x32xf32> to vector<64x32xbf16>
    %c0_33 = arith.constant 0 : index
    %c0_34 = arith.constant 0 : index
    %66 = vector.load %arg4[%c0_33, %c0_34] : memref<32x128xbf16, #tpu.memory_space<vmem>>, vector<32x128xbf16>
    %cst_35 = arith.constant dense<0.000000e+00> : vector<64x128xf32>
    %67 = tpu.matmul %65, %66, %cst_35 {dimension_numbers = #tpu.dot_dimension_numbers<[1], [0], [0], [1], [0, 0, 1, 1], [], []>} : vector<64x32xbf16>, vector<32x128xbf16>, vector<64x128xf32> -> vector<64x128xf32>
    %c0_36 = arith.constant 0 : index
    %c0_37 = arith.constant 0 : index
    %68 = vector.load %arg5[%c0_36, %c0_37] : memref<1x128xf32, #tpu.memory_space<vmem>>, vector<1x128xf32>
    %69 = vector.broadcast %68 : vector<1x128xf32> to vector<64x128xf32>
    %70 = arith.addf %67, %69 : vector<64x128xf32>
    %c10_i32_38 = arith.constant 10 : i32
    %71 = vector.broadcast %c10_i32_38 : i32 to vector<64x128xi32>
    %72 = arith.cmpi slt, %1, %71 : vector<64x128xi32>
    %73 = arith.negf %70 : vector<64x128xf32>
    %74 = math.exp %73 : vector<64x128xf32>
    %cst_39 = arith.constant 1.000000e+00 : f32
    %75 = vector.broadcast %cst_39 : f32 to vector<64x128xf32>
    %76 = arith.addf %75, %74 : vector<64x128xf32>
    %77 = arith.divf %75, %76 : vector<64x128xf32>
    %78 = arith.select %72, %77, %70 : vector<64x128xi1>, vector<64x128xf32>
    %c1_40 = arith.constant 1 : index
    %c0_41 = arith.constant 0 : index
    %c0_42 = arith.constant 0 : index
    %79 = vector.load %arg6[%c1_40, %c0_41, %c0_42] : memref<2x64x128xf32, #tpu.memory_space<vmem>>, vector<1x64x128xf32>
    %80 = vector.shape_cast %79 : vector<1x64x128xf32> to vector<64x128xf32>
    %81 = vector.shape_cast %78 : vector<64x128xf32> to vector<1x64x128xf32>
    tpu.vector_store %arg6[%c1_40, %c0_41, %c0_42], %81 {strides = array<i32>} : memref<2x64x128xf32, #tpu.memory_space<vmem>>, vector<1x64x128xf32>,
    return
  }
  func.func @transform_0(%arg0: i32) -> (i32, i32, i32) {
    %c0_i32 = arith.constant 0 : i32
    %c0_i32_0 = arith.constant 0 : i32
    %c0_i32_1 = arith.constant 0 : i32
    return %arg0, %c0_i32, %c0_i32_0 : i32, i32, i32
  }
  func.func @transform_1(%arg0: i32) -> (i32, i32) {
    %c0_i32 = arith.constant 0 : i32
    %c0_i32_0 = arith.constant 0 : i32
    %c0_i32_1 = arith.constant 0 : i32
    return %c0_i32, %c0_i32_0 : i32, i32
  }
  func.func @transform_2(%arg0: i32) -> (i32, i32) {
    %c0_i32 = arith.constant 0 : i32
    %c0_i32_0 = arith.constant 0 : i32
    %c0_i32_1 = arith.constant 0 : i32
    return %c0_i32, %c0_i32_0 : i32, i32
  }
  func.func @transform_3(%arg0: i32) -> (i32, i32) {
    %c0_i32 = arith.constant 0 : i32
    %c0_i32_0 = arith.constant 0 : i32
    %c0_i32_1 = arith.constant 0 : i32
    return %c0_i32, %c0_i32_0 : i32, i32
  }
  func.func @transform_4(%arg0: i32) -> (i32, i32) {
    %c0_i32 = arith.constant 0 : i32
    %c0_i32_0 = arith.constant 0 : i32
    %c0_i32_1 = arith.constant 0 : i32
    return %c0_i32, %c0_i32_0 : i32, i32
  }
  func.func @transform_5(%arg0: i32) -> (i32, i32, i32) {
    %c0_i32 = arith.constant 0 : i32
    %c0_i32_0 = arith.constant 0 : i32
    %c0_i32_1 = arith.constant 0 : i32
    return %arg0, %c0_i32, %c0_i32_0 : i32, i32, i32
  }
}

</mosaic_0001>

<bundles_post_ra>
// kernel: forward.1
= control target key start
LH: loop header
LB: loop body
LE: loop exit
PB: predicated region body
PF: predicated region fallthrough
CT: control target
= control target key end

     0   :  { %vm27_vm0 = vcmask 1043456   ;;  %vm53_vm1 = vcmask 1041408   ;;  %vm54_vm2 = vcmask 1042432   ;;  %v1462_v1 = vmov 65535   ;;  %s1806_s0 = inlined_call_operand.vmem [shape: f32[2,4,256], index: 0, kind: input, shape index: {}]   ;;  %s1807_s1 = inlined_call_operand.vmem [shape: bf16[32,5], index: 1, kind: input, shape index: {}]   ;;  %s1808_s2 = inlined_call_operand.vmem [shape: bf16[64,32], index: 2, kind: input, shape index: {}]   ;;  %s1809_s3 = inlined_call_operand.vmem [shape: bf16[32,128], index: 3, kind: input, shape index: {}]   ;;  %s1810_s4 = inlined_call_operand.vmem [shape: f32[1,128], index: 4, kind: input, shape index: {}]   ;;  %s1811_s5 = inlined_call_operand.vmem [shape: f32[2,64,128], index: 5, kind: output, shape index: {}]  }
   0x1   :  { %v23_v0 = vld [vmem:[%s1806_s0] sm:$0xff]  ;;  %v55_v2 = vsel %vm53_vm1, 4294967295, %v1462_v1  ;;  %v1463_v5 = vmov 0   ;;  %vm46_vm3 = vcmask 39936   ;;  %v1286_v13 = vld [vmem:[%s1807_s1 + $0x8] sm:$0xff]   ;;  %vm156_vm4 = vcmask 261120  }
   0x2   :  { %v25_v3 = vcombine.high %v23_v0, %v23_v0  ;;  %v28_v4 = vsel %vm27_vm0, %v23_v0, 1.0  ;;  %95 = vmatprep.mubr.bf16.mxu0 %v1463_v5  ;;  %201 = vmatprep.mubr.bf16.mxu1 %v1463_v5  ;;  %v1500_v6 = vsel %vm54_vm2, %v55_v2, 0  ;;  %v1285_v12 = vld [vmem:[%s1807_s1] sm:$0xff]   ;;  %v1288_v35 = vld [vmem:[%s1808_s2 + $0x8] sm:$0xff]   ;;  %v1289_v36 = vld [vmem:[%s1808_s2 + $0x10] sm:$0xff]  }
   0x3   :  { %v30_v7 = vpack.c.bf16 %v28_v4, %v28_v4  ;;  %v1287_v34 = vld [vmem:[%s1808_s2] sm:$0xff]   ;;  %v1290_v37 = vld [vmem:[%s1808_s2 + $0x18] sm:$0xff]  }
   0x4   :  { %v29_v8 = vsel %vm27_vm0, %v25_v3, 1.0 }
   0x5   :  { %v31_v9 = vpack.c.bf16 %v29_v8, %v29_v8  ;;  %v58_v10 = vand.u32 %v1500_v6, %v30_v7 }
   0x7   :  { %v61_v11 = vand.u32 %v1500_v6, %v31_v9 }
   0x9   :  { %77 = vmatprep.subr.bf16.mxu0 %v61_v11 }
   0xa   :  { %78 = vmatpush1.bf16.msra.mxu0 %v58_v10 }
   0xd   :  { %1185 = vmatmul.mubr.msk.bf16.vlgmr.msra.gmra.mxu0 %vm46_vm3, %v1285_v12 }
   0xe   :  { %105 = vmatprep.mubr.bf16.mxu0 %v1463_v5 }
  0x15   :  { %1186 = vmatmul.mubr.msk.bf16.gmra.mxu0 %vm46_vm3, %v1286_v13 }
  0xcd   :  { %v97_v14 = vpop.f32.mrf.mxu0 }
  0xce   :  { %v116_v32 = vmax.f32 %v97_v14, 0.0 }
  0xcf   :  { %v99_v15 = vpop.f32.mrf.mxu0 }
  0xd0   :  { %v117_v27 = vmax.f32 %v99_v15, 0.0 }
  0xd1   :  { %v101_v16 = vpop.f32.mrf.mxu0 }
  0xd2   :  { %v118_v29 = vmax.f32 %v101_v16, 0.0 }
  0xd3   :  { %v103_v17 = vpop.f32.mrf.mxu0 }
  0xd4   :  { %v119_v23 = vmax.f32 %v103_v17, 0.0  ;;  %v124_v33 = vpack.c.bf16 %v118_v29, %v116_v32 }
  0xd5   :  { %v107_v18 = vpop.f32.mrf.mxu0 }
  0xd6   :  { %v120_v26 = vmax.f32 %v107_v18, 0.0  ;;  %v125_v31 = vpack.c.bf16 %v119_v23, %v117_v27 }
  0xd7   :  { %v109_v19 = vpop.f32.mrf.mxu0 }
  0xd8   :  { %v121_v24 = vmax.f32 %v109_v19, 0.0 }
  0xd9   :  { %v111_v20 = vpop.f32.mrf.mxu0 }
  0xda   :  { %v122_v21 = vmax.f32 %v111_v20, 0.0 }
  0xdb   :  { %v113_v22 = vpop.f32.mrf.mxu0 }
  0xdc   :  { %v123_v25 = vmax.f32 %v113_v22, 0.0  ;;  %v126_v30 = vpack.c.bf16 %v122_v21, %v120_v26 }
  0xde   :  { %v127_v28 = vpack.c.bf16 %v123_v25, %v121_v24 }
  0xe0   :  { %181 = vmatprep.subr.bf16.mxu1 %v127_v28  ;;  %382 = vmatprep.subr.bf16.mxu0 %v127_v28 }
  0xe1   :  { %182 = vmatpush1.bf16.msra.mxu1 %v126_v30  ;;  %383 = vmatpush1.bf16.xpose.msra.mxu0 %v126_v30 }
  0xe2   :  { %183 = vmatprep.subr.bf16.mxu1 %v125_v31  ;;  %384 = vmatprep.subr.bf16.mxu0 %v125_v31 }
  0xe5   :  { %184 = vmatpush1.bf16.msra.mxu1 %v124_v33 }
  0xe8   :  { %1191 = vmatmul.mubr.msk.bf16.vlgmr.msra.gmra.mxu1 %vm156_vm4, %v1287_v34 }
  0xe9   :  { %385 = vmatpush1.bf16.xpose.msra.mxu0 %v124_v33  ;;  %211 = vmatprep.mubr.bf16.mxu1 %v1463_v5 }
  0xf0   :  { %1192 = vmatmul.mubr.msk.bf16.gmra.mxu1 %vm156_vm4, %v1288_v35 }
  0xf1   :  { %221 = vmatprep.mubr.bf16.mxu1 %v1463_v5 }
  0xf8   :  { %1193 = vmatmul.mubr.msk.bf16.gmra.mxu1 %vm156_vm4, %v1289_v36 }
  0xf9   :  { %231 = vmatprep.mubr.bf16.mxu1 %v1463_v5 }
 0x100   :  { %1194 = vmatmul.mubr.msk.bf16.gmra.mxu1 %vm156_vm4, %v1290_v37 }
 0x1a8   :  { %v203_v38 = vpop.f32.mrf.mxu1 }
 0x1aa   :  { %v205_v39 = vpop.f32.mrf.mxu1 }
 0x1ab   :  { %v242_v40 = vmax.f32 %v203_v38, %v205_v39 }
 0x1ac   :  { %v207_v41 = vpop.f32.mrf.mxu1 }
 0x1ad   :  { %243 = vmax.xlane.f32.xlu0 %v242_v40 }
 0x1ae   :  { %v209_v42 = vpop.f32.mrf.mxu1 }
 0x1af   :  { %v245_v43 = vmax.f32 %v207_v41, %v209_v42 }
 0x1b0   :  { %v213_v44 = vpop.f32.mrf.mxu1 }
 0x1b1   :  { %246 = vmax.xlane.f32.xlu0 %v245_v43 }
 0x1b2   :  { %v215_v45 = vpop.f32.mrf.mxu1 }
 0x1b3   :  { %v248_v46 = vmax.f32 %v213_v44, %v215_v45 }
 0x1b4   :  { %v217_v47 = vpop.f32.mrf.mxu1 }
 0x1b5   :  { %249 = vmax.xlane.f32.xlu1 %v248_v46 }
 0x1b6   :  { %v219_v48 = vpop.f32.mrf.mxu1 }
 0x1b7   :  { %v251_v49 = vmax.f32 %v217_v47, %v219_v48 }
 0x1b8   :  { %v223_v50 = vpop.f32.mrf.mxu1 }
 0x1b9   :  { %252 = vmax.xlane.f32.xlu1 %v251_v49 }
 0x1ba   :  { %v225_v51 = vpop.f32.mrf.mxu1 }
 0x1bb   :  { %v254_v52 = vmax.f32 %v223_v50, %v225_v51 }
 0x1bc   :  { %v227_v53 = vpop.f32.mrf.mxu1 }
 0x1bd   :  { %255 = vmax.xlane.f32.xlu0 %v254_v52 }
 0x1be   :  { %v229_v54 = vpop.f32.mrf.mxu1 }
 0x1bf   :  { %v257_v55 = vmax.f32 %v227_v53, %v229_v54 }
 0x1c0   :  { %v1533_v56 = vpop.f32.mrf.mxu1 }
 0x1c1   :  { %258 = vmax.xlane.f32.xlu1 %v257_v55 }
 0x1c2   :  { %v1535_v57 = vpop.f32.mrf.mxu1 }
 0x1c3   :  { %v260_v58 = vmax.f32 %v1533_v56, %v1535_v57 }
 0x1c4   :  { %v1539_v59 = vpop.f32.mrf.mxu1 }
 0x1c5   :  { %261 = vmax.xlane.f32.xlu0 %v260_v58 }
 0x1c6   :  { %v1541_v60 = vpop.f32.mrf.mxu1 }
 0x1c7   :  { %v263_v61 = vmax.f32 %v1539_v59, %v1541_v60 }
 0x1c9   :  { %264 = vmax.xlane.f32.xlu1 %v263_v61 }
 0x236   :  { %v244_v62 = vpop.xlane.xlu0 %243 }
 0x237   :  { %v266_v63 = vsub.f32 %v203_v38, %v244_v62  ;;  %v267_v0 = vsub.f32 %v205_v39, %v244_v62 }
 0x239   :  { %v282_v1 = vmul.f32 1.442695, %v266_v63  ;;  %v284_v2 = vmul.f32 1.442695, %v267_v0  ;;  %v1210_v0 = vld [vmem:[%s1806_s0 + $0x8] sm:$0xff] }
 0x23a   :  { %v247_v3 = vpop.xlane.xlu0 %246 }
 0x23b   :  { %1302 = vpow2.f32 %v282_v1  ;;  %v268_v4 = vsub.f32 %v207_v41, %v247_v3  ;;  %v269_v7 = vsub.f32 %v209_v42, %v247_v3  ;;  %v607_v1 = vcombine.high %v1210_v0, %v1210_v0 }
 0x23c   :  { %1304 = vpow2.f32 %v284_v2 }
 0x23d   :  { %v286_v8 = vmul.f32 1.442695, %v268_v4  ;;  %v288_v9 = vmul.f32 1.442695, %v269_v7  ;;  %v610_v2 = vsel %vm27_vm0, %v607_v1, 1.0 }
 0x23e   :  { %v250_v10 = vpop.xlane.xlu1 %249  ;;  %v612_v3 = vpack.c.bf16 %v610_v2, %v610_v2 }
 0x23f   :  { %1306 = vpow2.f32 %v286_v8  ;;  %v270_v11 = vsub.f32 %v213_v44, %v250_v10  ;;  %v271_v12 = vsub.f32 %v215_v45, %v250_v10 }
 0x240   :  { %1308 = vpow2.f32 %v288_v9  ;;  %v637_v4 = vand.u32 %v612_v3, %v1500_v6 }
 0x241   :  { %v290_v13 = vmul.f32 1.442695, %v270_v11  ;;  %v292_v14 = vmul.f32 1.442695, %v271_v12  ;;  %v609_v11 = vsel %vm27_vm0, %v1210_v0, 1.0 }
 0x242   :  { %v253_v15 = vpop.xlane.xlu1 %252  ;;  %653 = vmatprep.subr.bf16.mxu0 %v637_v4 }
 0x243   :  { %1310 = vpow2.f32 %v290_v13  ;;  %v272_v16 = vsub.f32 %v217_v47, %v253_v15  ;;  %v273_v17 = vsub.f32 %v219_v48, %v253_v15 }
 0x244   :  { %1312 = vpow2.f32 %v292_v14  ;;  %v611_v14 = vpack.c.bf16 %v609_v11, %v609_v11 }
 0x245   :  { %v294_v18 = vmul.f32 1.442695, %v272_v16  ;;  %v296_v19 = vmul.f32 1.442695, %v273_v17 }
 0x246   :  { %v256_v20 = vpop.xlane.xlu0 %255 }
 0x247   :  { %1314 = vpow2.f32 %v294_v18  ;;  %v274_v21 = vsub.f32 %v223_v50, %v256_v20  ;;  %v275_v22 = vsub.f32 %v225_v51, %v256_v20 }
 0x248   :  { %v1545_v23 = vpop.eup %1302  ;;  %1316 = vpow2.f32 %v296_v19 }
 0x249   :  { %v1547_v24 = vpop.eup %1304  ;;  %v298_v25 = vmul.f32 1.442695, %v274_v21  ;;  %v300_v26 = vmul.f32 1.442695, %v275_v22 }
 0x24a   :  { %v259_v27 = vpop.xlane.xlu1 %258  ;;  %v314_v28 = vadd.f32 %v1547_v24, %v1545_v23 }
 0x24b   :  { %1318 = vpow2.f32 %v298_v25  ;;  %v276_v29 = vsub.f32 %v227_v53, %v259_v27  ;;  %v277_v30 = vsub.f32 %v229_v54, %v259_v27  ;;  %v634_v25 = vand.u32 %v611_v14, %v1500_v6 }
 0x24c   :  { %v1551_v31 = vpop.eup %1306  ;;  %1320 = vpow2.f32 %v300_v26  ;;  %315 = vadd.xlane.f32.xlu0 %v314_v28 }
 0x24d   :  { %v1553_v32 = vpop.eup %1308  ;;  %v302_v33 = vmul.f32 1.442695, %v276_v29  ;;  %v304_v34 = vmul.f32 1.442695, %v277_v30 }
 0x24e   :  { %v262_v35 = vpop.xlane.xlu0 %261  ;;  %v317_v36 = vadd.f32 %v1553_v32, %v1551_v31 }
 0x24f   :  { %1322 = vpow2.f32 %v302_v33  ;;  %v278_v37 = vsub.f32 %v1533_v56, %v262_v35  ;;  %v279_v38 = vsub.f32 %v1535_v57, %v262_v35 }
 0x250   :  { %v1559_v39 = vpop.eup %1310  ;;  %1324 = vpow2.f32 %v304_v34  ;;  %318 = vadd.xlane.f32.xlu1 %v317_v36 }
 0x251   :  { %v1561_v40 = vpop.eup %1312  ;;  %v306_v41 = vmul.f32 1.442695, %v278_v37  ;;  %v308_v42 = vmul.f32 1.442695, %v279_v38 }
 0x252   :  { %v265_v43 = vpop.xlane.xlu1 %264  ;;  %v320_v44 = vadd.f32 %v1561_v40, %v1559_v39 }
 0x253   :  { %1326 = vpow2.f32 %v306_v41  ;;  %v280_v45 = vsub.f32 %v1539_v59, %v265_v43  ;;  %v281_v46 = vsub.f32 %v1541_v60, %v265_v43 }
 0x254   :  { %v1567_v47 = vpop.eup %1314  ;;  %1328 = vpow2.f32 %v308_v42  ;;  %321 = vadd.xlane.f32.xlu0 %v320_v44 }
 0x255   :  { %v1317_v48 = vpop.eup %1316  ;;  %v310_v49 = vmul.f32 1.442695, %v280_v45  ;;  %v312_v50 = vmul.f32 1.442695, %v281_v46 }
 0x256   :  { %v323_v51 = vadd.f32 %v1317_v48, %v1567_v47 }
 0x257   :  { %1330 = vpow2.f32 %v310_v49  ;;  %v1292_v49 = vld [vmem:[%s1807_s1] sm:$0xff]  }
 0x258   :  { %v1570_v52 = vpop.eup %1318  ;;  %1332 = vpow2.f32 %v312_v50  ;;  %324 = vadd.xlane.f32.xlu1 %v323_v51  ;;  %v1293_v50 = vld [vmem:[%s1807_s1 + $0x8] sm:$0xff]  }
 0x259   :  { %v1572_v53 = vpop.eup %1320  ;;  %v1294_v51 = vld [vmem:[%s1809_s3 + $0x8] sm:$0xff]  }
 0x25a   :  { %v326_v54 = vadd.f32 %v1572_v53, %v1570_v52  ;;  %1258 = vmatprep.subr.bf16.mxu1 %v1294_v51 }
 0x25b   :  { %1259 = vmatpush3.bf16.msra.mxu1 %v1294_v51 }
 0x25c   :  { %v1576_v55 = vpop.eup %1322  ;;  %327 = vadd.xlane.f32.xlu0 %v326_v54 }
 0x25d   :  { %v1325_v56 = vpop.eup %1324 }
 0x25e   :  { %v329_v57 = vadd.f32 %v1325_v56, %v1576_v55 }
 0x260   :  { %v1579_v58 = vpop.eup %1326  ;;  %330 = vadd.xlane.f32.xlu1 %v329_v57 }
 0x261   :  { %v1581_v59 = vpop.eup %1328 }
 0x262   :  { %v332_v60 = vadd.f32 %v1581_v59, %v1579_v58 }
 0x264   :  { %v1585_v61 = vpop.eup %1330  ;;  %333 = vadd.xlane.f32.xlu0 %v332_v60 }
 0x265   :  { %v1333_v62 = vpop.eup %1332 }
 0x266   :  { %v335_v63 = vadd.f32 %v1333_v62, %v1585_v61 }
 0x268   :  { %336 = vadd.xlane.f32.xlu1 %v335_v63 }
 0x2d5   :  { %v316_v7 = vpop.xlane.xlu0 %315 }
 0x2d6   :  { %1334 = vrcp.f32 %v316_v7 }
 0x2d9   :  { %v319_v8 = vpop.xlane.xlu1 %318 }
 0x2da   :  { %1336 = vrcp.f32 %v319_v8 }
 0x2dd   :  { %v322_v9 = vpop.xlane.xlu0 %321 }
 0x2de   :  { %1338 = vrcp.f32 %v322_v9 }
 0x2e1   :  { %v325_v10 = vpop.xlane.xlu1 %324 }
 0x2e2   :  { %1340 = vrcp.f32 %v325_v10 }
 0x2e3   :  { %v1335_v12 = vpop.eup %1334 }
 0x2e4   :  { %v347_v16 = vmul.f32 %v1335_v12, %v1547_v24  ;;  %v346_v18 = vmul.f32 %v1335_v12, %v1545_v23 }
 0x2e5   :  { %v328_v13 = vpop.xlane.xlu0 %327 }
 0x2e6   :  { %1342 = vrcp.f32 %v328_v13 }
 0x2e7   :  { %v1337_v15 = vpop.eup %1336 }
 0x2e8   :  { %v349_v17 = vmul.f32 %v1337_v15, %v1553_v32  ;;  %v348_v19 = vmul.f32 %v1337_v15, %v1551_v31 }
 0x2e9   :  { %v331_v20 = vpop.xlane.xlu1 %330 }
 0x2ea   :  { %1344 = vrcp.f32 %v331_v20  ;;  %v363_v21 = vpack.c.bf16 %v349_v17, %v347_v16  ;;  %v362_v22 = vpack.c.bf16 %v348_v19, %v346_v18 }
 0x2eb   :  { %v1339_v26 = vpop.eup %1338 }
 0x2ec   :  { %402 = vmatprep.mubr.bf16.mxu0 %v363_v21  ;;  %v351_v24 = vmul.f32 %v1339_v26, %v1561_v40  ;;  %v350_v23 = vmul.f32 %v1339_v26, %v1559_v39 }
 0x2ed   :  { %v334_v27 = vpop.xlane.xlu0 %333  ;;  %403 = vmatmul.mubr.bf16.vlgmr.msra.gmra.mxu0 %v362_v22 }
 0x2ee   :  { %654 = vmatpush1.bf16.msra.mxu0 %v634_v25  ;;  %1346 = vrcp.f32 %v334_v27 }
 0x2ef   :  { %v1341_v28 = vpop.eup %1340 }
 0x2f0   :  { %v353_v29 = vmul.f32 %v1341_v28, %v1317_v48  ;;  %v352_v30 = vmul.f32 %v1341_v28, %v1567_v47 }
 0x2f1   :  { %v337_v31 = vpop.xlane.xlu1 %336 }
 0x2f2   :  { %1348 = vrcp.f32 %v337_v31  ;;  %v365_v32 = vpack.c.bf16 %v353_v29, %v351_v24  ;;  %v364_v33 = vpack.c.bf16 %v352_v30, %v350_v23  ;;  %v1296_v31 = vld [vmem:[%s1808_s2] sm:$0xff]  }
 0x2f3   :  { %v1343_v6 = vpop.eup %1342 }
 0x2f4   :  { %410 = vmatprep.mubr.bf16.mxu0 %v365_v32  ;;  %v355_v35 = vmul.f32 %v1343_v6, %v1572_v53  ;;  %v354_v37 = vmul.f32 %v1343_v6, %v1570_v52  ;;  %v1295_v52 = vld [vmem:[%s1809_s3] sm:$0xff]   ;;  %v1297_v32 = vld [vmem:[%s1808_s2 + $0x8] sm:$0xff]   ;;  %v1299_v6 = vld [vmem:[%s1808_s2 + $0x18] sm:$0xff]  }
 0x2f5   :  { %411 = vmatmul.mubr.bf16.gmra.mxu0 %v364_v33  ;;  %1260 = vmatprep.subr.bf16.mxu1 %v1295_v52  ;;  %v1298_v33 = vld [vmem:[%s1808_s2 + $0x10] sm:$0xff]  }
 0x2f6   :  { %1261 = vmatpush3.bf16.msra.mxu1 %v1295_v52 }
 0x2f7   :  { %v1345_v34 = vpop.eup %1344 }
 0x2f8   :  { %v357_v36 = vmul.f32 %v1345_v34, %v1325_v56  ;;  %v356_v38 = vmul.f32 %v1345_v34, %v1576_v55  ;;  %v1651_v34 = vld [vmem:[%s1810_s4] ss:$0 sm:$0xff] }
 0x2fa   :  { %v367_v40 = vpack.c.bf16 %v357_v36, %v355_v35  ;;  %v366_v41 = vpack.c.bf16 %v356_v38, %v354_v37 }
 0x2fb   :  { %v1347_v39 = vpop.eup %1346 }
 0x2fc   :  { %418 = vmatprep.mubr.bf16.mxu0 %v367_v40  ;;  %v359_v43 = vmul.f32 %v1347_v39, %v1581_v59  ;;  %v358_v45 = vmul.f32 %v1347_v39, %v1579_v58 }
 0x2fd   :  { %419 = vmatmul.mubr.bf16.gmra.mxu0 %v366_v41 }
 0x2ff   :  { %v1349_v42 = vpop.eup %1348 }
 0x300   :  { %v361_v44 = vmul.f32 %v1349_v42, %v1333_v62  ;;  %v360_v46 = vmul.f32 %v1349_v42, %v1585_v61 }
 0x302   :  { %v369_v47 = vpack.c.bf16 %v361_v44, %v359_v43  ;;  %v368_v48 = vpack.c.bf16 %v360_v46, %v358_v45 }
 0x304   :  { %426 = vmatprep.mubr.bf16.mxu0 %v369_v47 }
 0x305   :  { %427 = vmatmul.mubr.bf16.gmra.mxu0 %v368_v48 }
 0x306   :  { %671 = vmatprep.mubr.bf16.mxu0 %v1463_v5 }
 0x30d   :  { %1213 = vmatmul.mubr.msk.bf16.vlgmr.msra.gmra.mxu0 %vm46_vm3, %v1292_v49 }
 0x30e   :  { %681 = vmatprep.mubr.bf16.mxu0 %v1463_v5 }
 0x315   :  { %1214 = vmatmul.mubr.msk.bf16.gmra.mxu0 %vm46_vm3, %v1293_v50 }
 0x3ad   :  { %v404_v53 = vpop.f32.mrf.mxu0 }
 0x3af   :  { %v406_v54 = vpop.f32.mrf.mxu0 }
 0x3b1   :  { %v407_v55 = vpop.f32.mrf.mxu0 }
 0x3b2   :  { %v435_v56 = vpack.c.bf16 %v407_v55, %v404_v53 }
 0x3b3   :  { %v409_v57 = vpop.f32.mrf.mxu0 }
 0x3b4   :  { %1262 = vmatprep.mubr.msk.bf16.mxu1 %vm156_vm4, %v435_v56 }
 0x3b5   :  { %v412_v58 = vpop.f32.mrf.mxu0 }
 0x3b7   :  { %v414_v59 = vpop.f32.mrf.mxu0 }
 0x3b9   :  { %v415_v60 = vpop.f32.mrf.mxu0 }
 0x3ba   :  { %v436_v61 = vpack.c.bf16 %v415_v60, %v412_v58 }
 0x3bb   :  { %v417_v62 = vpop.f32.mrf.mxu0 }
 0x3bc   :  { %1263 = vmatmul.mubr.msk.bf16.vlgmr.msra.gmra.mxu1 %vm156_vm4, %v436_v61 }
 0x3bd   :  { %v420_v63 = vpop.f32.mrf.mxu0 }
 0x3bf   :  { %v422_v0 = vpop.f32.mrf.mxu0 }
 0x3c0   :  { %v21_v0 = vlaneseq }
 0x3c1   :  { %v423_v1 = vpop.f32.mrf.mxu0 }
 0x3c2   :  { %v437_v2 = vpack.c.bf16 %v423_v1, %v420_v63 }
 0x3c3   :  { %v425_v3 = vpop.f32.mrf.mxu0 }
 0x3c4   :  { %1266 = vmatprep.mubr.msk.bf16.mxu1 %vm156_vm4, %v437_v2  ;;  %v1670_v3 = vand.u32 127, %v21_v0 }
 0x3c5   :  { %v428_v4 = vpop.f32.mrf.mxu0 }
 0x3c6   :  { %vm539_vm5 = vcmp.lt.s32.totalorder %v1670_v3, 10 }
 0x3c7   :  { %v430_v7 = vpop.f32.mrf.mxu0 }
 0x3c9   :  { %v431_v8 = vpop.f32.mrf.mxu0 }
 0x3ca   :  { %v438_v9 = vpack.c.bf16 %v431_v8, %v428_v4 }
 0x3cb   :  { %v433_v10 = vpop.f32.mrf.mxu0 }
 0x3cc   :  { %1267 = vmatmul.mubr.msk.bf16.gmra.mxu1 %vm156_vm4, %v438_v9 }
 0x3cd   :  { %v673_v11 = vpop.f32.mrf.mxu0  ;;  %776 = vmatprep.mubr.bf16.mxu1 %v1463_v5 }
 0x3ce   :  { %v692_v23 = vmax.f32 %v673_v11, 0.0 }
 0x3cf   :  { %v675_v12 = vpop.f32.mrf.mxu0 }
 0x3d0   :  { %v693_v26 = vmax.f32 %v675_v12, 0.0 }
 0x3d1   :  { %v677_v13 = vpop.f32.mrf.mxu0 }
 0x3d2   :  { %v694_v28 = vmax.f32 %v677_v13, 0.0 }
 0x3d3   :  { %v679_v14 = vpop.f32.mrf.mxu0 }
 0x3d4   :  { %v695_v20 = vmax.f32 %v679_v14, 0.0  ;;  %v700_v30 = vpack.c.bf16 %v694_v28, %v692_v23 }
 0x3d5   :  { %v683_v15 = vpop.f32.mrf.mxu0 }
 0x3d6   :  { %v696_v25 = vmax.f32 %v683_v15, 0.0  ;;  %v701_v29 = vpack.c.bf16 %v695_v20, %v693_v26 }
 0x3d7   :  { %v685_v16 = vpop.f32.mrf.mxu0 }
 0x3d8   :  { %v697_v21 = vmax.f32 %v685_v16, 0.0 }
 0x3d9   :  { %v687_v17 = vpop.f32.mrf.mxu0 }
 0x3da   :  { %v698_v18 = vmax.f32 %v687_v17, 0.0 }
 0x3db   :  { %v689_v19 = vpop.f32.mrf.mxu0 }
 0x3dc   :  { %v699_v22 = vmax.f32 %v689_v19, 0.0  ;;  %v702_v24 = vpack.c.bf16 %v698_v18, %v696_v25 }
 0x3de   :  { %v703_v27 = vpack.c.bf16 %v699_v22, %v697_v21 }
 0x3e0   :  { %756 = vmatprep.subr.bf16.mxu1 %v703_v27  ;;  %957 = vmatprep.subr.bf16.mxu0 %v703_v27 }
 0x3e1   :  { %757 = vmatpush1.bf16.msra.mxu1 %v702_v24  ;;  %958 = vmatpush1.bf16.xpose.msra.mxu0 %v702_v24 }
 0x3e2   :  { %758 = vmatprep.subr.bf16.mxu1 %v701_v29  ;;  %959 = vmatprep.subr.bf16.mxu0 %v701_v29 }
 0x3e5   :  { %759 = vmatpush1.bf16.msra.mxu1 %v700_v30 }
 0x3e8   :  { %1219 = vmatmul.mubr.msk.bf16.vlgmr.msra.gmra.mxu1 %vm156_vm4, %v1296_v31 }
 0x3e9   :  { %960 = vmatpush1.bf16.xpose.msra.mxu0 %v700_v30  ;;  %786 = vmatprep.mubr.bf16.mxu1 %v1463_v5 }
 0x3f0   :  { %1220 = vmatmul.mubr.msk.bf16.gmra.mxu1 %vm156_vm4, %v1297_v32 }
 0x3f1   :  { %796 = vmatprep.mubr.bf16.mxu1 %v1463_v5 }
 0x3f8   :  { %1221 = vmatmul.mubr.msk.bf16.gmra.mxu1 %vm156_vm4, %v1298_v33 }
 0x3f9   :  { %806 = vmatprep.mubr.bf16.mxu1 %v1463_v5 }
 0x400   :  { %1222 = vmatmul.mubr.msk.bf16.gmra.mxu1 %vm156_vm4, %v1299_v6 }
 0x47c   :  { %v1264_v35 = vpop.f32.mrf.mxu1 }
 0x47d   :  { %v517_v36 = vadd.f32 %v1264_v35, %v1651_v34 }
 0x47e   :  { %v508_v37 = vpop.f32.mrf.mxu1 }
 0x47f   :  { %v1204_v38 = vmul.f32 -1.442695, %v517_v36  ;;  %v509_v40 = vadd.f32 %v1651_v34, %v508_v37 }
 0x480   :  { %v1265_v41 = vpop.f32.mrf.mxu1 }
 0x481   :  { %1350 = vpow2.f32 %v1204_v38  ;;  %v1202_v5 = vmul.f32 -1.442695, %v509_v40  ;;  %v520_v39 = vadd.f32 %v1265_v41, %v1651_v34 }
 0x482   :  { %v511_v42 = vpop.f32.mrf.mxu1 }
 0x483   :  { %1352 = vpow2.f32 %v1202_v5  ;;  %v1205_v43 = vmul.f32 -1.442695, %v520_v39  ;;  %v512_v44 = vadd.f32 %v1651_v34, %v511_v42 }
 0x485   :  { %1354 = vpow2.f32 %v1205_v43  ;;  %v1203_v45 = vmul.f32 -1.442695, %v512_v44 }
 0x487   :  { %1356 = vpow2.f32 %v1203_v45 }
 0x48c   :  { %v1268_v46 = vpop.f32.mrf.mxu1 }
 0x48d   :  { %v1658_v47 = vadd.f32 %v1268_v46, %v1651_v34 }
 0x48e   :  { %v1351_v48 = vpop.eup %1350  ;;  %v524_v49 = vpop.f32.mrf.mxu1 }
 0x48f   :  { %v566_v50 = vadd.f32 1.0, %v1351_v48  ;;  %v1208_v51 = vmul.f32 -1.442695, %v1658_v47  ;;  %v1662_v52 = vadd.f32 %v1651_v34, %v524_v49 }
 0x490   :  { %v1353_v53 = vpop.eup %1352  ;;  %v1269_v54 = vpop.f32.mrf.mxu1 }
 0x491   :  { %1358 = vrcp.f32 %v566_v50  ;;  %v564_v55 = vadd.f32 1.0, %v1353_v53  ;;  %v1206_v56 = vmul.f32 -1.442695, %v1662_v52  ;;  %v1666_v57 = vadd.f32 %v1269_v54, %v1651_v34 }
 0x492   :  { %v1355_v58 = vpop.eup %1354  ;;  %1360 = vpow2.f32 %v1208_v51  ;;  %v527_v59 = vpop.f32.mrf.mxu1 }
 0x493   :  { %1362 = vrcp.f32 %v564_v55  ;;  %v567_v60 = vadd.f32 1.0, %v1355_v58  ;;  %v1209_v61 = vmul.f32 -1.442695, %v1666_v57  ;;  %v528_v62 = vadd.f32 %v1651_v34, %v527_v59 }
 0x494   :  { %v1357_v63 = vpop.eup %1356  ;;  %1364 = vpow2.f32 %v1206_v56 }
 0x495   :  { %1366 = vrcp.f32 %v567_v60  ;;  %v565_v1 = vadd.f32 1.0, %v1357_v63  ;;  %v1207_v2 = vmul.f32 -1.442695, %v528_v62 }
 0x496   :  { %1368 = vpow2.f32 %v1209_v61 }
 0x497   :  { %1370 = vrcp.f32 %v565_v1 }
 0x498   :  { %1372 = vpow2.f32 %v1207_v2 }
 0x49e   :  { %v1359_v4 = vpop.eup %1358 }
 0x49f   :  { %v1361_v7 = vpop.eup %1360  ;;  %v590_v8 = vsel %vm539_vm5, %v1359_v4, %v517_v36 }
 0x4a0   :  { %v1363_v9 = vpop.eup %1362  ;;  %598 = vst [vmem:[%s1811_s5 + $0x10] sm:$0xff] %v590_v8  ;;  %v570_v10 = vadd.f32 1.0, %v1361_v7 }
 0x4a1   :  { %v1365_v11 = vpop.eup %1364  ;;  %v588_v12 = vsel %vm539_vm5, %v1363_v9, %v509_v40 }
 0x4a2   :  { %v1367_v13 = vpop.eup %1366  ;;  %596 = vst [vmem:[%s1811_s5] sm:$0xff] %v588_v12  ;;  %1374 = vrcp.f32 %v570_v10  ;;  %v568_v14 = vadd.f32 1.0, %v1365_v11 }
 0x4a3   :  { %v1369_v15 = vpop.eup %1368  ;;  %v591_v16 = vsel %vm539_vm5, %v1367_v13, %v520_v39 }
 0x4a4   :  { %v1371_v17 = vpop.eup %1370  ;;  %599 = vst [vmem:[%s1811_s5 + $0x18] sm:$0xff] %v591_v16  ;;  %1376 = vrcp.f32 %v568_v14  ;;  %v571_v18 = vadd.f32 1.0, %v1369_v15 }
 0x4a5   :  { %v1373_v19 = vpop.eup %1372  ;;  %v589_v20 = vsel %vm539_vm5, %v1371_v17, %v512_v44 }
 0x4a6   :  { %597 = vst [vmem:[%s1811_s5 + $0x8] sm:$0xff] %v589_v20  ;;  %1378 = vrcp.f32 %v571_v18  ;;  %v569_v21 = vadd.f32 1.0, %v1373_v19 }
 0x4a8   :  { %1380 = vrcp.f32 %v569_v21  ;;  %v778_v22 = vpop.f32.mrf.mxu1 }
 0x4aa   :  { %v780_v25 = vpop.f32.mrf.mxu1 }
 0x4ab   :  { %v817_v26 = vmax.f32 %v778_v22, %v780_v25 }
 0x4ac   :  { %v782_v27 = vpop.f32.mrf.mxu1 }
 0x4ad   :  { %818 = vmax.xlane.f32.xlu0 %v817_v26 }
 0x4ae   :  { %v784_v28 = vpop.f32.mrf.mxu1 }
 0x4af   :  { %v1375_v24 = vpop.eup %1374  ;;  %v820_v29 = vmax.f32 %v782_v27, %v784_v28 }
 0x4b0   :  { %v594_v23 = vsel %vm539_vm5, %v1375_v24, %v1658_v47  ;;  %v788_v30 = vpop.f32.mrf.mxu1 }
 0x4b1   :  { %v1377_v31 = vpop.eup %1376  ;;  %602 = vst [vmem:[%s1811_s5 + $0x30] sm:$0xff] %v594_v23  ;;  %821 = vmax.xlane.f32.xlu1 %v820_v29 }
 0x4b2   :  { %v592_v32 = vsel %vm539_vm5, %v1377_v31, %v1662_v52  ;;  %v790_v33 = vpop.f32.mrf.mxu1 }
 0x4b3   :  { %v1379_v6 = vpop.eup %1378  ;;  %600 = vst [vmem:[%s1811_s5 + $0x20] sm:$0xff] %v592_v32  ;;  %v823_v35 = vmax.f32 %v788_v30, %v790_v33 }
 0x4b4   :  { %v595_v36 = vsel %vm539_vm5, %v1379_v6, %v1666_v57  ;;  %v792_v37 = vpop.f32.mrf.mxu1 }
 0x4b5   :  { %v1381_v38 = vpop.eup %1380  ;;  %603 = vst [vmem:[%s1811_s5 + $0x38] sm:$0xff] %v595_v36  ;;  %824 = vmax.xlane.f32.xlu0 %v823_v35 }
 0x4b6   :  { %v593_v40 = vsel %vm539_vm5, %v1381_v38, %v528_v62  ;;  %v794_v41 = vpop.f32.mrf.mxu1 }
 0x4b7   :  { %601 = vst [vmem:[%s1811_s5 + $0x28] sm:$0xff] %v593_v40  ;;  %v826_v5 = vmax.f32 %v792_v37, %v794_v41 }
 0x4b8   :  { %v798_v39 = vpop.f32.mrf.mxu1 }
 0x4b9   :  { %827 = vmax.xlane.f32.xlu1 %v826_v5 }
 0x4ba   :  { %v800_v42 = vpop.f32.mrf.mxu1 }
 0x4bb   :  { %v829_v43 = vmax.f32 %v798_v39, %v800_v42 }
 0x4bc   :  { %v802_v44 = vpop.f32.mrf.mxu1 }
 0x4bd   :  { %830 = vmax.xlane.f32.xlu0 %v829_v43 }
 0x4be   :  { %v804_v45 = vpop.f32.mrf.mxu1 }
 0x4bf   :  { %v832_v46 = vmax.f32 %v802_v44, %v804_v45 }
 0x4c0   :  { %v1716_v47 = vpop.f32.mrf.mxu1 }
 0x4c1   :  { %833 = vmax.xlane.f32.xlu1 %v832_v46 }
 0x4c2   :  { %v1718_v48 = vpop.f32.mrf.mxu1 }
 0x4c3   :  { %v835_v49 = vmax.f32 %v1716_v47, %v1718_v48 }
 0x4c4   :  { %v1722_v50 = vpop.f32.mrf.mxu1 }
 0x4c5   :  { %836 = vmax.xlane.f32.xlu0 %v835_v49 }
 0x4c6   :  { %v1724_v51 = vpop.f32.mrf.mxu1 }
 0x4c7   :  { %v838_v52 = vmax.f32 %v1722_v50, %v1724_v51 }
 0x4c9   :  { %839 = vmax.xlane.f32.xlu1 %v838_v52 }
 0x536   :  { %v819_v53 = vpop.xlane.xlu0 %818 }
 0x537   :  { %v841_v54 = vsub.f32 %v778_v22, %v819_v53  ;;  %v842_v55 = vsub.f32 %v780_v25, %v819_v53 }
 0x539   :  { %v857_v56 = vmul.f32 1.442695, %v841_v54  ;;  %v859_v57 = vmul.f32 1.442695, %v842_v55  ;;  %v1300_v55 = vld [vmem:[%s1809_s3 + $0x8] sm:$0xff]  }
 0x53a   :  { %v822_v58 = vpop.xlane.xlu1 %821  ;;  %1270 = vmatprep.subr.bf16.mxu1 %v1300_v55 }
 0x53b   :  { %1382 = vpow2.f32 %v857_v56  ;;  %v843_v59 = vsub.f32 %v782_v27, %v822_v58  ;;  %v844_v60 = vsub.f32 %v784_v28, %v822_v58  ;;  %1271 = vmatpush3.bf16.msra.mxu1 %v1300_v55 }
 0x53c   :  { %1384 = vpow2.f32 %v859_v57 }
 0x53d   :  { %v861_v61 = vmul.f32 1.442695, %v843_v59  ;;  %v863_v62 = vmul.f32 1.442695, %v844_v60 }
 0x53e   :  { %v825_v63 = vpop.xlane.xlu0 %824 }
 0x53f   :  { %1386 = vpow2.f32 %v861_v61  ;;  %v845_v0 = vsub.f32 %v788_v30, %v825_v63  ;;  %v846_v1 = vsub.f32 %v790_v33, %v825_v63 }
 0x540   :  { %1388 = vpow2.f32 %v863_v62 }
 0x541   :  { %v865_v2 = vmul.f32 1.442695, %v845_v0  ;;  %v867_v4 = vmul.f32 1.442695, %v846_v1 }
 0x542   :  { %v828_v7 = vpop.xlane.xlu1 %827 }
 0x543   :  { %1390 = vpow2.f32 %v865_v2  ;;  %v847_v8 = vsub.f32 %v792_v37, %v828_v7  ;;  %v848_v9 = vsub.f32 %v794_v41, %v828_v7 }
 0x544   :  { %1392 = vpow2.f32 %v867_v4 }
 0x545   :  { %v869_v10 = vmul.f32 1.442695, %v847_v8  ;;  %v871_v11 = vmul.f32 1.442695, %v848_v9 }
 0x546   :  { %v831_v12 = vpop.xlane.xlu0 %830 }
 0x547   :  { %1394 = vpow2.f32 %v869_v10  ;;  %v849_v13 = vsub.f32 %v798_v39, %v831_v12  ;;  %v850_v14 = vsub.f32 %v800_v42, %v831_v12 }
 0x548   :  { %v1728_v15 = vpop.eup %1382  ;;  %1396 = vpow2.f32 %v871_v11 }
 0x549   :  { %v1730_v16 = vpop.eup %1384  ;;  %v873_v17 = vmul.f32 1.442695, %v849_v13  ;;  %v875_v18 = vmul.f32 1.442695, %v850_v14 }
 0x54a   :  { %v834_v19 = vpop.xlane.xlu1 %833  ;;  %v889_v20 = vadd.f32 %v1730_v16, %v1728_v15 }
 0x54b   :  { %1398 = vpow2.f32 %v873_v17  ;;  %v851_v21 = vsub.f32 %v802_v44, %v834_v19  ;;  %v852_v22 = vsub.f32 %v804_v45, %v834_v19 }
 0x54c   :  { %v1734_v25 = vpop.eup %1386  ;;  %1400 = vpow2.f32 %v875_v18  ;;  %890 = vadd.xlane.f32.xlu0 %v889_v20 }
 0x54d   :  { %v1389_v26 = vpop.eup %1388  ;;  %v877_v27 = vmul.f32 1.442695, %v851_v21  ;;  %v879_v28 = vmul.f32 1.442695, %v852_v22 }
 0x54e   :  { %v837_v24 = vpop.xlane.xlu0 %836  ;;  %v892_v29 = vadd.f32 %v1389_v26, %v1734_v25 }
 0x54f   :  { %1402 = vpow2.f32 %v877_v27  ;;  %v853_v23 = vsub.f32 %v1716_v47, %v837_v24  ;;  %v854_v30 = vsub.f32 %v1718_v48, %v837_v24 }
 0x550   :  { %v1739_v31 = vpop.eup %1390  ;;  %1404 = vpow2.f32 %v879_v28  ;;  %893 = vadd.xlane.f32.xlu1 %v892_v29 }
 0x551   :  { %v1393_v32 = vpop.eup %1392  ;;  %v881_v33 = vmul.f32 1.442695, %v853_v23  ;;  %v883_v6 = vmul.f32 1.442695, %v854_v30 }
 0x552   :  { %v840_v35 = vpop.xlane.xlu1 %839  ;;  %v895_v36 = vadd.f32 %v1393_v32, %v1739_v31 }
 0x553   :  { %1406 = vpow2.f32 %v881_v33  ;;  %v855_v37 = vsub.f32 %v1722_v50, %v840_v35  ;;  %v856_v38 = vsub.f32 %v1724_v51, %v840_v35  ;;  %v1301_v35 = vld [vmem:[%s1809_s3] sm:$0xff]  }
 0x554   :  { %v1395_v40 = vpop.eup %1394  ;;  %1408 = vpow2.f32 %v883_v6  ;;  %896 = vadd.xlane.f32.xlu0 %v895_v36  ;;  %1272 = vmatprep.subr.bf16.mxu1 %v1301_v35 }
 0x555   :  { %v1397_v41 = vpop.eup %1396  ;;  %v885_v5 = vmul.f32 1.442695, %v855_v37  ;;  %v887_v39 = vmul.f32 1.442695, %v856_v38  ;;  %1273 = vmatpush3.bf16.msra.mxu1 %v1301_v35 }
 0x556   :  { %v898_v42 = vadd.f32 %v1397_v41, %v1395_v40 }
 0x557   :  { %1410 = vpow2.f32 %v885_v5 }
 0x558   :  { %v1399_v43 = vpop.eup %1398  ;;  %1412 = vpow2.f32 %v887_v39  ;;  %899 = vadd.xlane.f32.xlu1 %v898_v42 }
 0x559   :  { %v1401_v44 = vpop.eup %1400 }
 0x55a   :  { %v901_v45 = vadd.f32 %v1401_v44, %v1399_v43 }
 0x55c   :  { %v1403_v46 = vpop.eup %1402  ;;  %902 = vadd.xlane.f32.xlu0 %v901_v45 }
 0x55d   :  { %v1405_v47 = vpop.eup %1404 }
 0x55e   :  { %v904_v48 = vadd.f32 %v1405_v47, %v1403_v46 }
 0x560   :  { %v1407_v49 = vpop.eup %1406  ;;  %905 = vadd.xlane.f32.xlu1 %v904_v48 }
 0x561   :  { %v1409_v50 = vpop.eup %1408 }
 0x562   :  { %v907_v51 = vadd.f32 %v1409_v50, %v1407_v49 }
 0x564   :  { %v1411_v52 = vpop.eup %1410  ;;  %908 = vadd.xlane.f32.xlu0 %v907_v51 }
 0x565   :  { %v1413_v53 = vpop.eup %1412 }
 0x566   :  { %v910_v54 = vadd.f32 %v1413_v53, %v1411_v52 }
 0x568   :  { %911 = vadd.xlane.f32.xlu1 %v910_v54 }
 0x5d5   :  { %v891_v56 = vpop.xlane.xlu0 %890 }
 0x5d6   :  { %1414 = vrcp.f32 %v891_v56 }
 0x5d9   :  { %v894_v57 = vpop.xlane.xlu1 %893 }
 0x5da   :  { %1416 = vrcp.f32 %v894_v57 }
 0x5dd   :  { %v897_v58 = vpop.xlane.xlu0 %896 }
 0x5de   :  { %1418 = vrcp.f32 %v897_v58 }
 0x5e1   :  { %v900_v59 = vpop.xlane.xlu1 %899 }
 0x5e2   :  { %1420 = vrcp.f32 %v900_v59 }
 0x5e3   :  { %v1415_v60 = vpop.eup %1414 }
 0x5e4   :  { %v922_v63 = vmul.f32 %v1415_v60, %v1730_v16  ;;  %v921_v1 = vmul.f32 %v1415_v60, %v1728_v15 }
 0x5e5   :  { %v903_v61 = vpop.xlane.xlu0 %902 }
 0x5e6   :  { %1422 = vrcp.f32 %v903_v61 }
 0x5e7   :  { %v1417_v62 = vpop.eup %1416 }
 0x5e8   :  { %v924_v0 = vmul.f32 %v1417_v62, %v1389_v26  ;;  %v923_v2 = vmul.f32 %v1417_v62, %v1734_v25 }
 0x5e9   :  { %v906_v4 = vpop.xlane.xlu1 %905 }
 0x5ea   :  { %1424 = vrcp.f32 %v906_v4  ;;  %v938_v7 = vpack.c.bf16 %v924_v0, %v922_v63  ;;  %v937_v8 = vpack.c.bf16 %v923_v2, %v921_v1 }
 0x5eb   :  { %v1419_v9 = vpop.eup %1418 }
 0x5ec   :  { %977 = vmatprep.mubr.bf16.mxu0 %v938_v7  ;;  %v926_v12 = vmul.f32 %v1419_v9, %v1393_v32  ;;  %v925_v14 = vmul.f32 %v1419_v9, %v1739_v31 }
 0x5ed   :  { %v909_v10 = vpop.xlane.xlu0 %908  ;;  %978 = vmatmul.mubr.bf16.vlgmr.msra.gmra.mxu0 %v937_v8 }
 0x5ee   :  { %1426 = vrcp.f32 %v909_v10 }
 0x5ef   :  { %v1421_v11 = vpop.eup %1420 }
 0x5f0   :  { %v928_v13 = vmul.f32 %v1421_v11, %v1397_v41  ;;  %v927_v16 = vmul.f32 %v1421_v11, %v1395_v40 }
 0x5f1   :  { %v912_v17 = vpop.xlane.xlu1 %911 }
 0x5f2   :  { %1428 = vrcp.f32 %v912_v17  ;;  %v940_v15 = vpack.c.bf16 %v928_v13, %v926_v12  ;;  %v939_v18 = vpack.c.bf16 %v927_v16, %v925_v14 }
 0x5f3   :  { %v1423_v19 = vpop.eup %1422 }
 0x5f4   :  { %985 = vmatprep.mubr.bf16.mxu0 %v940_v15  ;;  %v930_v21 = vmul.f32 %v1423_v19, %v1401_v44  ;;  %v929_v25 = vmul.f32 %v1423_v19, %v1399_v43 }
 0x5f5   :  { %986 = vmatmul.mubr.bf16.gmra.mxu0 %v939_v18 }
 0x5f7   :  { %v1425_v20 = vpop.eup %1424 }
 0x5f8   :  { %v932_v22 = vmul.f32 %v1425_v20, %v1405_v47  ;;  %v931_v26 = vmul.f32 %v1425_v20, %v1403_v46 }
 0x5fa   :  { %v942_v27 = vpack.c.bf16 %v932_v22, %v930_v21  ;;  %v941_v28 = vpack.c.bf16 %v931_v26, %v929_v25 }
 0x5fb   :  { %v1427_v24 = vpop.eup %1426 }
 0x5fc   :  { %993 = vmatprep.mubr.bf16.mxu0 %v942_v27  ;;  %v934_v23 = vmul.f32 %v1427_v24, %v1409_v50  ;;  %v933_v31 = vmul.f32 %v1427_v24, %v1407_v49 }
 0x5fd   :  { %994 = vmatmul.mubr.bf16.gmra.mxu0 %v941_v28 }
 0x5ff   :  { %v1429_v29 = vpop.eup %1428 }
 0x600   :  { %v936_v30 = vmul.f32 %v1429_v29, %v1413_v53  ;;  %v935_v32 = vmul.f32 %v1429_v29, %v1411_v52 }
 0x602   :  { %v944_v33 = vpack.c.bf16 %v936_v30, %v934_v23  ;;  %v943_v6 = vpack.c.bf16 %v935_v32, %v933_v31 }
 0x604   :  { %1001 = vmatprep.mubr.bf16.mxu0 %v944_v33 }
 0x605   :  { %1002 = vmatmul.mubr.bf16.gmra.mxu0 %v943_v6 }
 0x6ad   :  { %v979_v36 = vpop.f32.mrf.mxu0 }
 0x6af   :  { %v981_v37 = vpop.f32.mrf.mxu0 }
 0x6b1   :  { %v982_v38 = vpop.f32.mrf.mxu0 }
 0x6b2   :  { %v1010_v40 = vpack.c.bf16 %v982_v38, %v979_v36 }
 0x6b3   :  { %v984_v41 = vpop.f32.mrf.mxu0 }
 0x6b4   :  { %1274 = vmatprep.mubr.msk.bf16.mxu1 %vm156_vm4, %v1010_v40 }
 0x6b5   :  { %v987_v5 = vpop.f32.mrf.mxu0 }
 0x6b7   :  { %v989_v39 = vpop.f32.mrf.mxu0 }
 0x6b9   :  { %v990_v42 = vpop.f32.mrf.mxu0 }
 0x6ba   :  { %v1011_v43 = vpack.c.bf16 %v990_v42, %v987_v5 }
 0x6bb   :  { %v992_v44 = vpop.f32.mrf.mxu0 }
 0x6bc   :  { %1275 = vmatmul.mubr.msk.bf16.vlgmr.msra.gmra.mxu1 %vm156_vm4, %v1011_v43 }
 0x6bd   :  { %v995_v45 = vpop.f32.mrf.mxu0 }
 0x6bf   :  { %v997_v46 = vpop.f32.mrf.mxu0 }
 0x6c1   :  { %v998_v47 = vpop.f32.mrf.mxu0 }
 0x6c2   :  { %v1012_v48 = vpack.c.bf16 %v998_v47, %v995_v45 }
 0x6c3   :  { %v1000_v49 = vpop.f32.mrf.mxu0 }
 0x6c4   :  { %1278 = vmatprep.mubr.msk.bf16.mxu1 %vm156_vm4, %v1012_v48 }
 0x6c5   :  { %v1003_v50 = vpop.f32.mrf.mxu0 }
 0x6c7   :  { %v1005_v51 = vpop.f32.mrf.mxu0 }
 0x6c9   :  { %v1006_v52 = vpop.f32.mrf.mxu0 }
 0x6ca   :  { %v1013_v53 = vpack.c.bf16 %v1006_v52, %v1003_v50 }
 0x6cb   :  { %v1008_v54 = vpop.f32.mrf.mxu0 }
 0x6cc   :  { %1279 = vmatmul.mubr.msk.bf16.gmra.mxu1 %vm156_vm4, %v1013_v53 }
 0x77c   :  { %v1276_v55 = vpop.f32.mrf.mxu1 }
 0x77d   :  { %v1092_v56 = vadd.f32 %v1276_v55, %v1651_v34 }
 0x77e   :  { %v1083_v57 = vpop.f32.mrf.mxu1 }
 0x77f   :  { %v1232_v58 = vmul.f32 -1.442695, %v1092_v56  ;;  %v1084_v59 = vadd.f32 %v1651_v34, %v1083_v57 }
 0x780   :  { %v1277_v60 = vpop.f32.mrf.mxu1 }
 0x781   :  { %1430 = vpow2.f32 %v1232_v58  ;;  %v1230_v61 = vmul.f32 -1.442695, %v1084_v59  ;;  %v1095_v62 = vadd.f32 %v1277_v60, %v1651_v34 }
 0x782   :  { %v1086_v63 = vpop.f32.mrf.mxu1 }
 0x783   :  { %1432 = vpow2.f32 %v1230_v61  ;;  %v1233_v0 = vmul.f32 -1.442695, %v1095_v62  ;;  %v1087_v1 = vadd.f32 %v1651_v34, %v1086_v63 }
 0x785   :  { %1434 = vpow2.f32 %v1233_v0  ;;  %v1231_v2 = vmul.f32 -1.442695, %v1087_v1 }
 0x787   :  { %1436 = vpow2.f32 %v1231_v2 }
 0x78c   :  { %v1280_v4 = vpop.f32.mrf.mxu1 }
 0x78d   :  { %v1108_v7 = vadd.f32 %v1280_v4, %v1651_v34 }
 0x78e   :  { %v1431_v8 = vpop.eup %1430  ;;  %v1099_v9 = vpop.f32.mrf.mxu1 }
 0x78f   :  { %v1140_v10 = vadd.f32 1.0, %v1431_v8  ;;  %v1236_v11 = vmul.f32 -1.442695, %v1108_v7  ;;  %v1100_v12 = vadd.f32 %v1651_v34, %v1099_v9 }
 0x790   :  { %v1433_v13 = vpop.eup %1432  ;;  %v1281_v14 = vpop.f32.mrf.mxu1 }
 0x791   :  { %1438 = vrcp.f32 %v1140_v10  ;;  %v1138_v16 = vadd.f32 1.0, %v1433_v13  ;;  %v1234_v17 = vmul.f32 -1.442695, %v1100_v12  ;;  %v1111_v15 = vadd.f32 %v1281_v14, %v1651_v34 }
 0x792   :  { %v1435_v18 = vpop.eup %1434  ;;  %1440 = vpow2.f32 %v1236_v11  ;;  %v1102_v19 = vpop.f32.mrf.mxu1 }
 0x793   :  { %1442 = vrcp.f32 %v1138_v16  ;;  %v1141_v20 = vadd.f32 1.0, %v1435_v18  ;;  %v1237_v21 = vmul.f32 -1.442695, %v1111_v15  ;;  %v1103_v22 = vadd.f32 %v1651_v34, %v1102_v19 }
 0x794   :  { %v1437_v25 = vpop.eup %1436  ;;  %1444 = vpow2.f32 %v1234_v17 }
 0x795   :  { %1446 = vrcp.f32 %v1141_v20  ;;  %v1139_v26 = vadd.f32 1.0, %v1437_v25  ;;  %v1235_v27 = vmul.f32 -1.442695, %v1103_v22 }
 0x796   :  { %1448 = vpow2.f32 %v1237_v21 }
 0x797   :  { %1450 = vrcp.f32 %v1139_v26 }
 0x798   :  { %1452 = vpow2.f32 %v1235_v27 }
 0x79e   :  { %v1439_v28 = vpop.eup %1438 }
 0x79f   :  { %v1441_v24 = vpop.eup %1440  ;;  %v1164_v29 = vsel %vm539_vm5, %v1439_v28, %v1092_v56 }
 0x7a0   :  { %v1443_v23 = vpop.eup %1442  ;;  %1240 = vst [vmem:[%s1811_s5 + $0x50] sm:$0xff] %v1164_v29  ;;  %v1144_v30 = vadd.f32 1.0, %v1441_v24 }
 0x7a1   :  { %v1445_v34 = vpop.eup %1444  ;;  %v1162_v31 = vsel %vm539_vm5, %v1443_v23, %v1084_v59 }
 0x7a2   :  { %v1447_v32 = vpop.eup %1446  ;;  %1238 = vst [vmem:[%s1811_s5 + $0x40] sm:$0xff] %v1162_v31  ;;  %1454 = vrcp.f32 %v1144_v30  ;;  %v1142_v33 = vadd.f32 1.0, %v1445_v34 }
 0x7a3   :  { %v1449_v6 = vpop.eup %1448  ;;  %v1165_v35 = vsel %vm539_vm5, %v1447_v32, %v1095_v62 }
 0x7a4   :  { %v1451_v36 = vpop.eup %1450  ;;  %1241 = vst [vmem:[%s1811_s5 + $0x58] sm:$0xff] %v1165_v35  ;;  %1456 = vrcp.f32 %v1142_v33  ;;  %v1145_v37 = vadd.f32 1.0, %v1449_v6 }
 0x7a5   :  { %v1453_v38 = vpop.eup %1452  ;;  %v1163_v40 = vsel %vm539_vm5, %v1451_v36, %v1087_v1 }
 0x7a6   :  { %1239 = vst [vmem:[%s1811_s5 + $0x48] sm:$0xff] %v1163_v40  ;;  %1458 = vrcp.f32 %v1145_v37  ;;  %v1143_v41 = vadd.f32 1.0, %v1453_v38 }
 0x7a8   :  { %1460 = vrcp.f32 %v1143_v41 }
 0x7af   :  { %v1455_v5 = vpop.eup %1454 }
 0x7b0   :  { %v1168_v39 = vsel %vm539_vm5, %v1455_v5, %v1108_v7 }
 0x7b1   :  { %v1457_v42 = vpop.eup %1456  ;;  %1244 = vst [vmem:[%s1811_s5 + $0x70] sm:$0xff] %v1168_v39 }
 0x7b2   :  { %v1166_v43 = vsel %vm539_vm5, %v1457_v42, %v1100_v12 }
 0x7b3   :  { %v1459_v44 = vpop.eup %1458  ;;  %1242 = vst [vmem:[%s1811_s5 + $0x60] sm:$0xff] %v1166_v43 }
 0x7b4   :  { %v1169_v45 = vsel %vm539_vm5, %v1459_v44, %v1111_v15 }
 0x7b5   :  { %v1461_v46 = vpop.eup %1460  ;;  %1245 = vst [vmem:[%s1811_s5 + $0x78] sm:$0xff] %v1169_v45 }
 0x7b6   :  { %v1167_v47 = vsel %vm539_vm5, %v1461_v46, %v1103_v22 }
 0x7b7   :  { %1243 = vst [vmem:[%s1811_s5 + $0x68] sm:$0xff] %v1167_v47 }

</bundles_post_ra>
